<compile_context>
chip_gen: v7x
topology: tpu7x:2x2x1
jax: 0.10.0
libtpu: 0.0.40
codegen_flags: <defaults>
</compile_context>

<pallas_src>
import jax
import jax.numpy as jnp
from jax import lax
from jax.experimental import pallas as pl
from jax.experimental.pallas import tpu as pltpu

_BN_EPS = 1e-5


def _cgr_kernel(x_ref, x1_ref, w_ref, b_ref,
                g1_ref, be1_ref, g2_ref, be2_ref, o_ref):
    x = x_ref[...]                                   # (B, Cg, D) f32
    x1 = x1_ref[...]                                 # (B, Cg, D) f32
    B, Cg, D = x.shape

    # --- fc: one tall MXU matmul over the collapsed (B*Cg, D) rows -------------
    # bf16 operands, f32 accumulation.  Cg is a multiple of 8 (or the full clip
    # count), so the (B, Cg, D) -> (B*Cg, D) collapse is layout-friendly.
    lhs = x.reshape(B * Cg, D).astype(jnp.bfloat16)
    x2 = jnp.dot(lhs, w_ref[...], preferred_element_type=jnp.float32)
    x2 = x2.reshape(B, Cg, D) + b_ref[...]           # (1, D) bias broadcasts

    inv_n = 1.0 / (B * D)                            # elements per BN channel (clip)

    def _bn(v, g_ref, beta_ref):
        # Single-pass biased batch stats per clip (training mode): sum and
        # sum-of-squares together, var = E[v^2] - m^2, then fold gamma / rsqrt /
        # mean / beta into one per-clip scale + shift so the apply is a single
        # multiply-add per element.
        s1 = jnp.sum(v, axis=(0, 2), keepdims=True)          # (1, Cg, 1)
        s2 = jnp.sum(v * v, axis=(0, 2), keepdims=True)      # (1, Cg, 1)
        m = s1 * inv_n
        var = s2 * inv_n - m * m
        scale = lax.rsqrt(var + _BN_EPS) * g_ref[...]        # (1, Cg, 1)
        shift = beta_ref[...] - m * scale
        return v * scale + shift

    t = _bn(x1, g1_ref, be1_ref) + _bn(x2, g2_ref, be2_ref)

    # --- glu(cat([x, t], -1), -1) == x * sigmoid(t) -----------------------------
    o_ref[...] = (x * jax.nn.sigmoid(t)).astype(o_ref.dtype)


def _clips_per_block(B, C, D):
    """Clips folded into one grid step (block second-to-last dim).

    Must be a multiple of 8 (sublane rule) or the full clip count.  Sized so the
    per-step working set stays inside a conservative (v7x 64 MiB VMEM-safe)
    budget, prefers a tall MXU M-dim (B*Cg >= 256) and keeps >= 2 grid steps so
    both v7x TensorCores get work.
    """
    if C % 8 != 0:
        return C                                     # full-dim block is always legal
    vmem_budget = 24 << 20                           # bytes for slabs + temporaries
    per_clip = 9 * B * D * 4                         # 3 dbl-buffered f32 slabs + ~3 temps
    cands = [c for c in range(8, C, 8)               # exclude C itself -> >= 2 steps
             if C % c == 0 and c * per_clip <= vmem_budget]
    if not cands:
        # TODO(synk): if even an 8-clip slab (plus temporaries) exceeds VMEM,
        # switch to a two-phase batch-tiled BN (accumulate sum/sumsq, then apply).
        return C if C * per_clip <= vmem_budget else 8
    for c in cands:
        if B * c >= 256:
            return c                                 # smallest MXU-tall candidate
    return cands[-1]                                 # largest that fits


@jax.jit
def context_gating_reasoning(x, x1, w, b, gamma1, beta1, gamma2, beta2):
    """x, x1: (B, n_clips, D) f32.  w: (D, D) in PyTorch nn.Linear layout (out, in).
    b: (D,).  gamma*/beta*: (n_clips,) BatchNorm1d affine parameters."""
    B, C, D = x.shape
    Cg = _clips_per_block(B, C, D)
    grid = (C // Cg,)

    # One-time D x D weight transpose + bf16 cast (negligible vs activation slabs).
    w_t = jnp.transpose(w).astype(jnp.bfloat16)      # (in, out): kernel does x @ w_t
    b2d = b.reshape(1, D).astype(jnp.float32)
    g1 = gamma1.reshape(1, C, 1)
    be1 = beta1.reshape(1, C, 1)
    g2 = gamma2.reshape(1, C, 1)
    be2 = beta2.reshape(1, C, 1)

    slab = pl.BlockSpec((B, Cg, D), lambda g: (0, g, 0))       # native layout block
    chan = pl.BlockSpec((1, Cg, 1), lambda g: (0, g, 0))       # per-clip BN params
    resident = lambda shape: pl.BlockSpec(shape, lambda g, _s=shape: (0,) * len(_s))

    cost = pl.CostEstimate(
        flops=2 * B * C * D * D + 14 * B * C * D,
        transcendentals=B * C * D + 2 * C,
        bytes_accessed=4 * 3 * B * C * D + 2 * D * D + 4 * D + 4 * 4 * C,
    )

    return pl.pallas_call(
        _cgr_kernel,
        out_shape=jax.ShapeDtypeStruct((B, C, D), x.dtype),
        grid=grid,
        in_specs=[
            slab,                    # x   : (B, Cg, D) per step
            slab,                    # x1
            resident((D, D)),        # W (bf16), VMEM-resident across grid steps
            resident((1, D)),        # b
            chan, chan, chan, chan,  # gamma1, beta1, gamma2, beta2
        ],
        out_specs=slab,
        compiler_params=pltpu.CompilerParams(
            dimension_semantics=("parallel",),       # clips independent -> megacore
            vmem_limit_bytes=48 * 1024 * 1024,       # explicit, v7x-safe
        ),
        cost_estimate=cost,
    )(x, x1, w_t, b2d, g1, be1, g2, be2)


def _reference(x, x1, w, b, gamma1, beta1, gamma2, beta2, eps=_BN_EPS):
    """Pure-JAX reference for ContextGatingReasoning.forward (training mode)."""
    x2 = jnp.einsum("bcd,ed->bce", x, w) + b          # nn.Linear: x @ W^T + b

    def bn(v, gamma, beta):
        mean = jnp.mean(v, axis=(0, 2), keepdims=True)
        var = jnp.mean((v - mean) ** 2, axis=(0, 2), keepdims=True)
        return gamma[None, :, None] * (v - mean) / jnp.sqrt(var + eps) \
            + beta[None, :, None]

    t = bn(x1, gamma1, beta1) + bn(x2, gamma2, beta2)
    return x * jax.nn.sigmoid(t)


if __name__ == "__main__":
    # dimension = 128 (lane-dense), n_clips = 16 (-> Cg = 8, grid = (2,)), batch = 8.
    B, C, D = 8, 16, 128

    key = jax.random.PRNGKey(0)
    kx, kx1, kw, kb, kg1, kbe1, kg2, kbe2 = jax.random.split(key, 8)

    x = jax.random.normal(kx, (B, C, D), dtype=jnp.float32)
    x1 = jax.random.normal(kx1, (B, C, D), dtype=jnp.float32)

    # PyTorch nn.Linear default init: U(-1/sqrt(fan_in), 1/sqrt(fan_in)), (out, in) layout.
    bnd = 1.0 / (D ** 0.5)
    w = jax.random.uniform(kw, (D, D), jnp.float32, -bnd, bnd)
    b = jax.random.uniform(kb, (D,), jnp.float32, -bnd, bnd)

    # BatchNorm1d(n_clips) affine params (PyTorch defaults gamma=1, beta=0;
    # perturbed to exercise the per-clip parameter path).
    gamma1 = 1.0 + 0.1 * jax.random.normal(kg1, (C,), dtype=jnp.float32)
    beta1 = 0.1 * jax.random.normal(kbe1, (C,), dtype=jnp.float32)
    gamma2 = 1.0 + 0.1 * jax.random.normal(kg2, (C,), dtype=jnp.float32)
    beta2 = 0.1 * jax.random.normal(kbe2, (C,), dtype=jnp.float32)

    out = context_gating_reasoning(x, x1, w, b, gamma1, beta1, gamma2, beta2)
    out = jax.block_until_ready(out)

    ref = _reference(x, x1, w, b, gamma1, beta1, gamma2, beta2)
    assert out.shape == (B, C, D)
    # bf16 matmul operands (f32 accumulation) -> loosened tolerance.
    max_err = float(jnp.max(jnp.abs(out - ref)))
    assert jnp.allclose(out, ref, atol=2e-2, rtol=2e-2), \
        f"mismatch vs reference (max abs err {max_err})"

    print("KERNEL_OK")
</pallas_src>

<mosaic_0001>
module attributes {stable_mosaic.version = 11 : i64} {
  func.func @_cgr_kernel(%arg0: i32, %arg1: memref<8x8x128xf32, #tpu.memory_space<vmem>>, %arg2: memref<8x8x128xf32, #tpu.memory_space<vmem>>, %arg3: memref<128x128xbf16, #tpu.memory_space<vmem>>, %arg4: memref<1x128xf32, #tpu.memory_space<vmem>>, %arg5: memref<1x8x1xf32, #tpu.memory_space<vmem>>, %arg6: memref<1x8x1xf32, #tpu.memory_space<vmem>>, %arg7: memref<1x8x1xf32, #tpu.memory_space<vmem>>, %arg8: memref<1x8x1xf32, #tpu.memory_space<vmem>>, %arg9: memref<8x8x128xf32, #tpu.memory_space<vmem>>) attributes {dimension_semantics = [#tpu.dimension_semantics<parallel>], iteration_bounds = array<i64: 2>, scalar_prefetch = 0 : i64, scratch_operands = 0 : i64, tpu.core_type = #tpu.core_type<tc>, window_params = [{transform_indices = @transform_0, window_bounds = array<i64: 8, 8, 128>}, {transform_indices = @transform_1, window_bounds = array<i64: 8, 8, 128>}, {pipeline_mode = #tpu.pipeline_mode<synchronous>, transform_indices = @transform_2, window_bounds = array<i64: 128, 128>}, {pipeline_mode = #tpu.pipeline_mode<synchronous>, transform_indices = @transform_3, window_bounds = array<i64: 1, 128>}, {transform_indices = @transform_4, window_bounds = array<i64: 1, 8, 1>}, {transform_indices = @transform_5, window_bounds = array<i64: 1, 8, 1>}, {transform_indices = @transform_6, window_bounds = array<i64: 1, 8, 1>}, {transform_indices = @transform_7, window_bounds = array<i64: 1, 8, 1>}, {transform_indices = @transform_8, window_bounds = array<i64: 8, 8, 128>}]} {
    %c0 = arith.constant 0 : index
    %c0_0 = arith.constant 0 : index
    %c0_1 = arith.constant 0 : index
    %0 = vector.load %arg1[%c0, %c0_0, %c0_1] : memref<8x8x128xf32, #tpu.memory_space<vmem>>, vector<8x8x128xf32>
    %c0_2 = arith.constant 0 : index
    %c0_3 = arith.constant 0 : index
    %c0_4 = arith.constant 0 : index
    %1 = vector.load %arg2[%c0_2, %c0_3, %c0_4] : memref<8x8x128xf32, #tpu.memory_space<vmem>>, vector<8x8x128xf32>
    %2 = vector.shape_cast %0 : vector<8x8x128xf32> to vector<64x128xf32>
    %3 = arith.truncf %2 : vector<64x128xf32> to vector<64x128xbf16>
    %c0_5 = arith.constant 0 : index
    %c0_6 = arith.constant 0 : index
    %4 = vector.load %arg3[%c0_5, %c0_6] : memref<128x128xbf16, #tpu.memory_space<vmem>>, vector<128x128xbf16>
    %cst = arith.constant dense<0.000000e+00> : vector<64x128xf32>
    %5 = tpu.matmul %3, %4, %cst {dimension_numbers = #tpu.dot_dimension_numbers<[1], [0], [0], [1], [0, 0, 1, 1], [], []>} : vector<64x128xbf16>, vector<128x128xbf16>, vector<64x128xf32> -> vector<64x128xf32>
    %6 = vector.shape_cast %5 : vector<64x128xf32> to vector<8x8x128xf32>
    %c0_7 = arith.constant 0 : index
    %c0_8 = arith.constant 0 : index
    %7 = vector.load %arg4[%c0_7, %c0_8] : memref<1x128xf32, #tpu.memory_space<vmem>>, vector<1x128xf32>
    %8 = vector.shape_cast %7 : vector<1x128xf32> to vector<1x1x128xf32>
    %9 = vector.broadcast %8 : vector<1x1x128xf32> to vector<8x8x128xf32>
    %10 = arith.addf %6, %9 : vector<8x8x128xf32>
    %cst_9 = arith.constant dense<0.000000e+00> : vector<8xf32>
    %11 = vector.multi_reduction <add>, %1, %cst_9 [0, 2] : vector<8x8x128xf32> to vector<8xf32>
    %12 = vector.shape_cast %11 : vector<8xf32> to vector<1x8x1xf32>
    %13 = arith.mulf %1, %1 : vector<8x8x128xf32>
    %cst_10 = arith.constant dense<0.000000e+00> : vector<8xf32>
    %14 = vector.multi_reduction <add>, %13, %cst_10 [0, 2] : vector<8x8x128xf32> to vector<8xf32>
    %15 = vector.shape_cast %14 : vector<8xf32> to vector<1x8x1xf32>
    %cst_11 = arith.constant 9.765625E-4 : f32
    %16 = vector.broadcast %cst_11 : f32 to vector<1x8x1xf32>
    %17 = arith.mulf %12, %16 : vector<1x8x1xf32>
    %cst_12 = arith.constant 9.765625E-4 : f32
    %18 = vector.broadcast %cst_12 : f32 to vector<1x8x1xf32>
    %19 = arith.mulf %15, %18 : vector<1x8x1xf32>
    %20 = arith.mulf %17, %17 : vector<1x8x1xf32>
    %21 = arith.subf %19, %20 : vector<1x8x1xf32>
    %cst_13 = arith.constant 9.99999974E-6 : f32
    %22 = vector.broadcast %cst_13 : f32 to vector<1x8x1xf32>
    %23 = arith.addf %21, %22 : vector<1x8x1xf32>
    %24 = math.rsqrt %23 : vector<1x8x1xf32>
    %c0_14 = arith.constant 0 : index
    %c0_15 = arith.constant 0 : index
    %c0_16 = arith.constant 0 : index
    %25 = vector.load %arg5[%c0_14, %c0_15, %c0_16] : memref<1x8x1xf32, #tpu.memory_space<vmem>>, vector<1x8x1xf32>
    %26 = arith.mulf %24, %25 : vector<1x8x1xf32>
    %c0_17 = arith.constant 0 : index
    %c0_18 = arith.constant 0 : index
    %c0_19 = arith.constant 0 : index
    %27 = vector.load %arg6[%c0_17, %c0_18, %c0_19] : memref<1x8x1xf32, #tpu.memory_space<vmem>>, vector<1x8x1xf32>
    %28 = arith.mulf %17, %26 : vector<1x8x1xf32>
    %29 = arith.subf %27, %28 : vector<1x8x1xf32>
    %30 = vector.broadcast %26 : vector<1x8x1xf32> to vector<8x8x128xf32>
    %31 = arith.mulf %1, %30 : vector<8x8x128xf32>
    %32 = vector.broadcast %29 : vector<1x8x1xf32> to vector<8x8x128xf32>
    %33 = arith.addf %31, %32 : vector<8x8x128xf32>
    %cst_20 = arith.constant dense<0.000000e+00> : vector<8xf32>
    %34 = vector.multi_reduction <add>, %10, %cst_20 [0, 2] : vector<8x8x128xf32> to vector<8xf32>
    %35 = vector.shape_cast %34 : vector<8xf32> to vector<1x8x1xf32>
    %36 = arith.mulf %10, %10 : vector<8x8x128xf32>
    %cst_21 = arith.constant dense<0.000000e+00> : vector<8xf32>
    %37 = vector.multi_reduction <add>, %36, %cst_21 [0, 2] : vector<8x8x128xf32> to vector<8xf32>
    %38 = vector.shape_cast %37 : vector<8xf32> to vector<1x8x1xf32>
    %cst_22 = arith.constant 9.765625E-4 : f32
    %39 = vector.broadcast %cst_22 : f32 to vector<1x8x1xf32>
    %40 = arith.mulf %35, %39 : vector<1x8x1xf32>
    %cst_23 = arith.constant 9.765625E-4 : f32
    %41 = vector.broadcast %cst_23 : f32 to vector<1x8x1xf32>
    %42 = arith.mulf %38, %41 : vector<1x8x1xf32>
    %43 = arith.mulf %40, %40 : vector<1x8x1xf32>
    %44 = arith.subf %42, %43 : vector<1x8x1xf32>
    %cst_24 = arith.constant 9.99999974E-6 : f32
    %45 = vector.broadcast %cst_24 : f32 to vector<1x8x1xf32>
    %46 = arith.addf %44, %45 : vector<1x8x1xf32>
    %47 = math.rsqrt %46 : vector<1x8x1xf32>
    %c0_25 = arith.constant 0 : index
    %c0_26 = arith.constant 0 : index
    %c0_27 = arith.constant 0 : index
    %48 = vector.load %arg7[%c0_25, %c0_26, %c0_27] : memref<1x8x1xf32, #tpu.memory_space<vmem>>, vector<1x8x1xf32>
    %49 = arith.mulf %47, %48 : vector<1x8x1xf32>
    %c0_28 = arith.constant 0 : index
    %c0_29 = arith.constant 0 : index
    %c0_30 = arith.constant 0 : index
    %50 = vector.load %arg8[%c0_28, %c0_29, %c0_30] : memref<1x8x1xf32, #tpu.memory_space<vmem>>, vector<1x8x1xf32>
    %51 = arith.mulf %40, %49 : vector<1x8x1xf32>
    %52 = arith.subf %50, %51 : vector<1x8x1xf32>
    %53 = vector.broadcast %49 : vector<1x8x1xf32> to vector<8x8x128xf32>
    %54 = arith.mulf %10, %53 : vector<8x8x128xf32>
    %55 = vector.broadcast %52 : vector<1x8x1xf32> to vector<8x8x128xf32>
    %56 = arith.addf %54, %55 : vector<8x8x128xf32>
    %57 = arith.addf %33, %56 : vector<8x8x128xf32>
    %58 = arith.negf %57 : vector<8x8x128xf32>
    %59 = math.exp %58 : vector<8x8x128xf32>
    %cst_31 = arith.constant 1.000000e+00 : f32
    %60 = vector.broadcast %cst_31 : f32 to vector<8x8x128xf32>
    %61 = arith.addf %60, %59 : vector<8x8x128xf32>
    %62 = arith.divf %60, %61 : vector<8x8x128xf32>
    %63 = arith.mulf %0, %62 : vector<8x8x128xf32>
    %c0_32 = arith.constant 0 : index
    %c0_33 = arith.constant 0 : index
    %c0_34 = arith.constant 0 : index
    %64 = vector.load %arg9[%c0_32, %c0_33, %c0_34] : memref<8x8x128xf32, #tpu.memory_space<vmem>>, vector<8x8x128xf32>
    tpu.vector_store %arg9[%c0_32, %c0_33, %c0_34], %63 {strides = array<i32>} : memref<8x8x128xf32, #tpu.memory_space<vmem>>, vector<8x8x128xf32>,
    return
  }
  func.func @transform_0(%arg0: i32) -> (i32, i32, i32) {
    %c0_i32 = arith.constant 0 : i32
    %c0_i32_0 = arith.constant 0 : i32
    %c0_i32_1 = arith.constant 0 : i32
    return %c0_i32, %arg0, %c0_i32_0 : i32, i32, i32
  }
  func.func @transform_1(%arg0: i32) -> (i32, i32, i32) {
    %c0_i32 = arith.constant 0 : i32
    %c0_i32_0 = arith.constant 0 : i32
    %c0_i32_1 = arith.constant 0 : i32
    return %c0_i32, %arg0, %c0_i32_0 : i32, i32, i32
  }
  func.func @transform_2(%arg0: i32) -> (i32, i32) {
    %c0_i32 = arith.constant 0 : i32
    %c0_i32_0 = arith.constant 0 : i32
    %c0_i32_1 = arith.constant 0 : i32
    return %c0_i32, %c0_i32_0 : i32, i32
  }
  func.func @transform_3(%arg0: i32) -> (i32, i32) {
    %c0_i32 = arith.constant 0 : i32
    %c0_i32_0 = arith.constant 0 : i32
    %c0_i32_1 = arith.constant 0 : i32
    return %c0_i32, %c0_i32_0 : i32, i32
  }
  func.func @transform_4(%arg0: i32) -> (i32, i32, i32) {
    %c0_i32 = arith.constant 0 : i32
    %c0_i32_0 = arith.constant 0 : i32
    %c0_i32_1 = arith.constant 0 : i32
    return %c0_i32, %arg0, %c0_i32_0 : i32, i32, i32
  }
  func.func @transform_5(%arg0: i32) -> (i32, i32, i32) {
    %c0_i32 = arith.constant 0 : i32
    %c0_i32_0 = arith.constant 0 : i32
    %c0_i32_1 = arith.constant 0 : i32
    return %c0_i32, %arg0, %c0_i32_0 : i32, i32, i32
  }
  func.func @transform_6(%arg0: i32) -> (i32, i32, i32) {
    %c0_i32 = arith.constant 0 : i32
    %c0_i32_0 = arith.constant 0 : i32
    %c0_i32_1 = arith.constant 0 : i32
    return %c0_i32, %arg0, %c0_i32_0 : i32, i32, i32
  }
  func.func @transform_7(%arg0: i32) -> (i32, i32, i32) {
    %c0_i32 = arith.constant 0 : i32
    %c0_i32_0 = arith.constant 0 : i32
    %c0_i32_1 = arith.constant 0 : i32
    return %c0_i32, %arg0, %c0_i32_0 : i32, i32, i32
  }
  func.func @transform_8(%arg0: i32) -> (i32, i32, i32) {
    %c0_i32 = arith.constant 0 : i32
    %c0_i32_0 = arith.constant 0 : i32
    %c0_i32_1 = arith.constant 0 : i32
    return %c0_i32, %arg0, %c0_i32_0 : i32, i32, i32
  }
}

</mosaic_0001>

<bundles_post_ra>
// kernel: context_gating_reasoning.1
= control target key start
LH: loop header
LB: loop body
LE: loop exit
PB: predicated region body
PF: predicated region fallthrough
CT: control target
= control target key end

     0   :  { %13 = vsyncpa [#allocation5], 0  ;;  %s1636_s0 = inlined_call_operand.vmem [shape: f32[8,16,128], index: 0, kind: input, shape index: {}]   ;;  %s1637_s1 = inlined_call_operand.vmem [shape: f32[8,16,128], index: 1, kind: input, shape index: {}]   ;;  %s1638_s2 = inlined_call_operand.vmem [shape: bf16[128,128], index: 2, kind: input, shape index: {}]   ;;  %s1639_s3 = inlined_call_operand.vmem [shape: f32[1,128], index: 3, kind: input, shape index: {}]   ;;  %s1640_s4 = inlined_call_operand.vmem [shape: f32[1,16,1], index: 4, kind: input, shape index: {}]   ;;  %s1641_s5 = inlined_call_operand.vmem [shape: f32[1,16,1], index: 5, kind: input, shape index: {}]   ;;  %s1642_s6 = inlined_call_operand.vmem [shape: f32[1,16,1], index: 6, kind: input, shape index: {}]   ;;  %s1643_s7 = inlined_call_operand.vmem [shape: f32[1,16,1], index: 7, kind: input, shape index: {}]   ;;  %s1644_s8 = inlined_call_operand.hbm [shape: f32[8,16,128], index: 8, kind: output, shape index: {}]  }
   0x1   :  { %15 = vsyncpa [#allocation5 + $0x1], 0  ;;  %s1317_s27 = smov 0   ;;  %s1319_s28 = smov 0  }
   0x2   :  { %s1321_s29 = smov 0   ;;  %s1323_s30 = smov 0  }
   0x3 LB: > { %s1338_s9 = sadd.s32 4294967295, %s1265_s30   ;;  %s1026_s10 = sadd.s32 4294967294, %s1265_s30   ;;  %s1265_s30 = sphi %s1323_s30, %s1651_s30   ;;  %s1261_s29 = sphi %s1321_s29, %s1650_s29   ;;  %s1257_s28 = sphi %s1319_s28, %s1649_s28   ;;  %s1253_s27 = sphi %s1317_s27, %s1648_s27  }
   0x4   : > { %s1342_s11 = sadd.s32 1, %s1265_s30   ;;  %s28_s12 = sadd.s32 1, %s1261_s29 }
   0x5   : > { %s25_s13 = ssub.s32 %s1265_s30, %s1342_s11  ;;  %p35_p0 = scmp.ne.s32.totalorder %s1261_s29, %s1257_s28 }
   0x6   : > { %p26_p1 = scmp.eq.s32.totalorder %s25_s13, 0  ;;  %p36_p2 = scmp.eq.s32.totalorder %s1265_s30, 0 }
   0x7   : > { %p237_p3 = scmp.eq.s32.totalorder %s1338_s9, 1  ;;  %p242_p4 = scmp.ne.s32.totalorder %s1257_s28, %s1253_s27 }
   0x8   : > { %s1354_s14 = scalar_select %p26_p1, %s1261_s29, %s28_s12  }
   0x9   : > { %p1356_p5 = por %p36_p2, %p35_p0  ;;  %p1360_p6 = por %p237_p3, %p35_p0 }
   0xa   : > { %p243_p7 = scmp.eq.s32.totalorder %s1026_s10, 1  ;;  %p1028_p9 = scmp.ge.s32.totalorder %s1265_s30, 2 }
   0xc   : > { %p1364_p8 = por %p243_p7, %p242_p4  ;;  %265 = sbr.rel (%p1028_p9) target bundleno = 35 (0x23), region = 24 }
  0x13   : > { %268 = sbr.rel (!%p1356_p5) target bundleno = 27 (0x1b), region = 28  ;;  %s270_s18 = sand.u32 (%p1356_p5), 1, %s1261_s29  }
  0x14   : > { %s1030_s19 = sshll.u32 (%p1356_p5), %s1265_s30, 3  ;;  %s1029_s20 = sshll.u32 (%p1356_p5), %s270_s18, 6 }
  0x15   : > { %s274_s23 = scalar_lea.vmem (%p1356_p5), %s1636_s0, %s1030_s19  ;;  %s272_s24 = scalar_lea.vmem (%p1356_p5), [#allocation2], %s1029_s20 }
  0x16   : > { %v316_v0 = vld [vmem:[%s274_s23] sm:$0xff] (%p1356_p5)  ;;  %v318_v1 = vld [vmem:[%s274_s23 + $0x10] sm:$0xff] (%p1356_p5) }
  0x17   : > { %v320_v2 = vld [vmem:[%s274_s23 + $0x20] sm:$0xff] (%p1356_p5)  ;;  %317 = vst [vmem:[%s272_s24] sm:$0xff] (%p1356_p5), %v316_v0  ;;  %319 = vst [vmem:[%s272_s24 + $0x8] sm:$0xff] (%p1356_p5), %v318_v1  ;;  %v322_v3 = vld [vmem:[%s274_s23 + $0x30] sm:$0xff] (%p1356_p5) }
  0x18   : > { %321 = vst [vmem:[%s272_s24 + $0x10] sm:$0xff] (%p1356_p5), %v320_v2  ;;  %v324_v4 = vld [vmem:[%s274_s23 + $0x40] sm:$0xff] (%p1356_p5)  ;;  %v326_v5 = vld [vmem:[%s274_s23 + $0x50] sm:$0xff] (%p1356_p5)  ;;  %323 = vst [vmem:[%s272_s24 + $0x18] sm:$0xff] (%p1356_p5), %v322_v3 }
  0x19   : > { %325 = vst [vmem:[%s272_s24 + $0x20] sm:$0xff] (%p1356_p5), %v324_v4  ;;  %327 = vst [vmem:[%s272_s24 + $0x28] sm:$0xff] (%p1356_p5), %v326_v5  ;;  %v328_v6 = vld [vmem:[%s274_s23 + $0x60] sm:$0xff] (%p1356_p5)  ;;  %v330_v7 = vld [vmem:[%s274_s23 + $0x70] sm:$0xff] (%p1356_p5) }
  0x1a   : > { %329 = vst [vmem:[%s272_s24 + $0x30] sm:$0xff] %v328_v6  ;;  %331 = vst [vmem:[%s272_s24 + $0x38] sm:$0xff] %v330_v7 }
  0x1b PF: > { %337 = sbr.rel (!%p1356_p5) target bundleno = 35 (0x23), region = 66  ;;  %s339_s25 = sand.u32 (%p1356_p5), 1, %s1261_s29  }
  0x1c   : > { %s1032_s26 = sshll.u32 (%p1356_p5), %s1265_s30, 3  ;;  %s1031_s10 = sshll.u32 (%p1356_p5), %s339_s25, 6 }
  0x1d   : > { %s343_s18 = scalar_lea.vmem (%p1356_p5), %s1637_s1, %s1032_s26  ;;  %s341_s19 = scalar_lea.vmem (%p1356_p5), [#allocation3], %s1031_s10 }
  0x1e   : > { %v385_v8 = vld [vmem:[%s343_s18] sm:$0xff] (%p1356_p5)  ;;  %v387_v9 = vld [vmem:[%s343_s18 + $0x10] sm:$0xff] (%p1356_p5) }
  0x1f   : > { %v389_v10 = vld [vmem:[%s343_s18 + $0x20] sm:$0xff] (%p1356_p5)  ;;  %386 = vst [vmem:[%s341_s19] sm:$0xff] (%p1356_p5), %v385_v8  ;;  %388 = vst [vmem:[%s341_s19 + $0x8] sm:$0xff] (%p1356_p5), %v387_v9  ;;  %v391_v11 = vld [vmem:[%s343_s18 + $0x30] sm:$0xff] (%p1356_p5) }
  0x20   : > { %390 = vst [vmem:[%s341_s19 + $0x10] sm:$0xff] (%p1356_p5), %v389_v10  ;;  %v393_v12 = vld [vmem:[%s343_s18 + $0x40] sm:$0xff] (%p1356_p5)  ;;  %v395_v13 = vld [vmem:[%s343_s18 + $0x50] sm:$0xff] (%p1356_p5)  ;;  %392 = vst [vmem:[%s341_s19 + $0x18] sm:$0xff] (%p1356_p5), %v391_v11 }
  0x21   : > { %394 = vst [vmem:[%s341_s19 + $0x20] sm:$0xff] (%p1356_p5), %v393_v12  ;;  %396 = vst [vmem:[%s341_s19 + $0x28] sm:$0xff] (%p1356_p5), %v395_v13  ;;  %v397_v14 = vld [vmem:[%s343_s18 + $0x60] sm:$0xff] (%p1356_p5)  ;;  %v399_v15 = vld [vmem:[%s343_s18 + $0x70] sm:$0xff] (%p1356_p5) }
  0x22   : > { %398 = vst [vmem:[%s341_s19 + $0x30] sm:$0xff] %v397_v14  ;;  %400 = vst [vmem:[%s341_s19 + $0x38] sm:$0xff] %v399_v15 }
  0x23 PF: > { %p1033_p10 = scmp.ge.s32.totalorder %s1265_s30, 1  ;;  %p433_p11 = scmp.lt.s32.totalorder %s1265_s30, 3 }
  0x25   : > { %p434_p12 = pnand %p1033_p10, %p433_p11 }
  0x26   : > { %v1159_v16 = vld [vmem:[%s1638_s2] sm:$0xff] (!%p434_p12)   ;;  %s440_s21 = sand.u32 (!%p434_p12), 1, %s1257_s28   ;;  %v1160_v17 = vld [vmem:[%s1638_s2 + $0x8] sm:$0xff] (!%p434_p12)   ;;  %v1161_v18 = vld [vmem:[%s1638_s2 + $0x10] sm:$0xff] (!%p434_p12)   ;;  %v1267_v2 = vmov (!%p434_p12), 0   ;;  %p500_p13 = scmp.lt.s32.totalorder (!%p434_p12), %s1338_s9, 1 }
  0x27   : > { %437 = sbr.rel (%p434_p12) target bundleno = 652 (0x28c), region = 120  ;;  %1074 = vmatprep.subr.bf16.mxu0 (!%p434_p12), %v1159_v16  ;;  %1098 = vmatprep.subr.bf16.mxu1 (!%p434_p12), %v1159_v16  ;;  %s1396_s24 = sshll.u32 (!%p434_p12), %s440_s21, 6  ;;  %v1162_v19 = vld [vmem:[%s1638_s2 + $0x18] sm:$0xff] (!%p434_p12)   ;;  %v1163_v31 = vld [vmem:[%s1638_s2 + $0x20] sm:$0xff] (!%p434_p12)   ;;  %v1164_v40 = vld [vmem:[%s1638_s2 + $0x28] sm:$0xff] (!%p434_p12)  }
  0x28   : > { %1075 = vmatpush3.bf16.msra.mxu0 (!%p434_p12), %v1159_v16  ;;  %1106 = vmatpush3.bf16.msra.mxu1 (!%p434_p12), %v1159_v16  ;;  %s1405_s13 = scalar_lea.vmem (!%p434_p12), [#allocation2], %s1396_s24  ;;  %s1424_s18 = scalar_lea.vmem (!%p434_p12), [#allocation3], %s1396_s24  ;;  %v1165_v49 = vld [vmem:[%s1638_s2 + $0x30] sm:$0xff] (!%p434_p12)   ;;  %v1166_v56 = vld [vmem:[%s1638_s2 + $0x38] sm:$0xff] (!%p434_p12)   ;;  %v1049_v6 = vld [vmem:[%s1639_s3] ss:$0 sm:$0xff] (!%p434_p12) }
  0x29   : > { %1076 = vmatprep.subr.bf16.mxu0 (!%p434_p12), %v1160_v17  ;;  %1099 = vmatprep.subr.bf16.mxu1 (!%p434_p12), %v1160_v17  ;;  %v1408_v20 = vld [vmem:[%s1405_s13] sm:$0xff] (!%p434_p12)  ;;  %v1411_v21 = vld [vmem:[%s1405_s13 + $0x8] sm:$0xff] (!%p434_p12)  ;;  %v1433_v28 = vld [vmem:[%s1424_s18 + $0x10] sm:$0xff] (!%p434_p12)  ;;  %s1059_s23 = sshll.u32 (!%p434_p12), %s1338_s9, 7  ;;  %s1268_s12 = smov (!%p434_p12), [#allocation4]  }
  0x2a   : > { %v533_v22 = vpack.c.bf16 (!%p434_p12), %v1411_v21, %v1408_v20  ;;  %v1416_v23 = vld [vmem:[%s1405_s13 + $0x20] sm:$0xff] (!%p434_p12)  ;;  %v1419_v24 = vld [vmem:[%s1405_s13 + $0x28] sm:$0xff] (!%p434_p12)  ;;  %v1436_v29 = vld [vmem:[%s1424_s18 + $0x18] sm:$0xff] (!%p434_p12)  ;;  %v692_v34 = vmul.f32 (!%p434_p12), %v1433_v28, %v1433_v28  ;;  %1157 = vset.pattern.permute.xlu0 (!%p434_p12), %v1267_v2  ;;  %1158 = vset.pattern.permute.xlu1 (!%p434_p12), %v1267_v2  ;;  %s1589_s25 = scalar_lea.hbm (!%p434_p12), %s1644_s8, %s1059_s23 }
  0x2b   : > { %v535_v25 = vpack.c.bf16 (!%p434_p12), %v1419_v24, %v1416_v23  ;;  %v1427_v26 = vld [vmem:[%s1424_s18] sm:$0xff] (!%p434_p12)  ;;  %v1430_v27 = vld [vmem:[%s1424_s18 + $0x8] sm:$0xff] (!%p434_p12)  ;;  %v693_v37 = vmul.f32 (!%p434_p12), %v1436_v29, %v1436_v29  ;;  %v1465_v44 = vld [vmem:[%s1424_s18 + $0x30] sm:$0xff] (!%p434_p12) }
  0x2c   : > { %1077 = vmatpush3.bf16.msra.mxu0 (!%p434_p12), %v1160_v17  ;;  %1107 = vmatpush3.bf16.msra.mxu1 (!%p434_p12), %v1160_v17  ;;  %v690_v30 = vmul.f32 (!%p434_p12), %v1427_v26, %v1427_v26  ;;  %v681_v32 = vadd.f32 (!%p434_p12), %v1430_v27, %v1427_v26  ;;  %v691_v33 = vmul.f32 (!%p434_p12), %v1430_v27, %v1430_v27  ;;  %v1450_v35 = vld [vmem:[%s1424_s18 + $0x20] sm:$0xff] (!%p434_p12)  ;;  %v1456_v39 = vld [vmem:[%s1424_s18 + $0x28] sm:$0xff] (!%p434_p12)  ;;  %v1471_v48 = vld [vmem:[%s1424_s18 + $0x38] sm:$0xff] (!%p434_p12) }
  0x2d   : > { %1078 = vmatprep.subr.bf16.mxu0 (!%p434_p12), %v1161_v18  ;;  %1100 = vmatprep.subr.bf16.mxu1 (!%p434_p12), %v1161_v18  ;;  %v694_v42 = vmul.f32 (!%p434_p12), %v1450_v35, %v1450_v35  ;;  %v695_v46 = vmul.f32 (!%p434_p12), %v1456_v39, %v1456_v39  ;;  %v696_v51 = vmul.f32 (!%p434_p12), %v1465_v44, %v1465_v44  ;;  %v1487_v59 = vld [vmem:[%s1405_s13 + $0x10] sm:$0xff] (!%p434_p12)  ;;  %v1490_v61 = vld [vmem:[%s1405_s13 + $0x18] sm:$0xff] (!%p434_p12) }
  0x2e   : > { %1090 = vmatprep.mubr.bf16.mxu0 %v533_v22  ;;  %1094 = vmatprep.mubr.bf16.mxu1 %v535_v25  ;;  %v682_v36 = vadd.f32 %v681_v32, %v1433_v28  ;;  %v698_v38 = vadd.f32 %v691_v33, %v690_v30  ;;  %v697_v54 = vmul.f32 %v1471_v48, %v1471_v48  ;;  %v1493_v62 = vld [vmem:[%s1405_s13 + $0x30] sm:$0xff]  ;;  %v1496_v63 = vld [vmem:[%s1405_s13 + $0x38] sm:$0xff]  ;;  %s501_s18 = scalar_select %p500_p13, %s1338_s9, 1 }
  0x2f   : > { %v534_v0 = vpack.c.bf16 %v1490_v61, %v1487_v59  ;;  %v536_v1 = vpack.c.bf16 %v1496_v63, %v1493_v62 }
  0x30   : > { %1079 = vmatpush3.bf16.msra.mxu0 %v1161_v18  ;;  %1108 = vmatpush3.bf16.msra.mxu1 %v1161_v18  ;;  %v683_v41 = vadd.f32 %v682_v36, %v1436_v29  ;;  %v699_v43 = vadd.f32 %v698_v38, %v692_v34  ;;  %s1037_s19 = sshll.u32 %s501_s18, 3 }
  0x31   : > { %1080 = vmatprep.subr.bf16.mxu0 %v1162_v19  ;;  %1101 = vmatprep.subr.bf16.mxu1 %v1162_v19  ;;  %s503_s22 = scalar_lea.vmem %s1640_s4, %s1037_s19  ;;  %s507_s26 = scalar_lea.vmem %s1641_s5, %s1037_s19 }
  0x32   : > { %v684_v45 = vadd.f32 %v683_v41, %v1450_v35  ;;  %v700_v47 = vadd.f32 %v699_v43, %v693_v37  ;;  %v713_v2 = vld [vmem:[%s503_s22] sm:$0xff]  ;;  %s511_s13 = scalar_lea.vmem %s1642_s6, %s1037_s19  ;;  %s515_s20 = scalar_lea.vmem %s1643_s7, %s1037_s19 }
  0x33   : > { %s499_s19 = scalar_lea.vmem [#allocation4], %s1396_s24 }
  0x34   : > { %1081 = vmatpush3.bf16.msra.mxu0 %v1162_v19  ;;  %1109 = vmatpush3.bf16.msra.mxu1 %v1162_v19  ;;  %v685_v50 = vadd.f32 %v684_v45, %v1456_v39  ;;  %v701_v52 = vadd.f32 %v700_v47, %v694_v42  ;;  %s892_s22 = sshll.u32 %s499_s19, 4  ;;  %s1582_s22 = int_to_ptr.vmem [resolvable:$true] %s892_s22 }
  0x35   : > { %1082 = vmatprep.subr.bf16.mxu0 %v1163_v31  ;;  %1102 = vmatprep.subr.bf16.mxu1 %v1163_v31  ;;  %s1203_s10 = scalar_lea.vmem %s1582_s22, 1024 }
  0x36   : > { %v686_v53 = vadd.f32 %v685_v50, %v1465_v44  ;;  %v702_v55 = vadd.f32 %v701_v52, %v695_v46  ;;  %p1204_p0 = scmp.ne.s32.totalorder %s1582_s22, %s1203_s10 }
  0x38   : > { %1083 = vmatpush3.bf16.msra.mxu0 %v1163_v31  ;;  %1110 = vmatpush3.bf16.msra.mxu1 %v1163_v31  ;;  %v687_v57 = vadd.f32 %v686_v53, %v1471_v48  ;;  %v703_v58 = vadd.f32 %v702_v55, %v696_v51  ;;  %p1205_p1 = pnand %p1204_p0, %p1360_p6 }
  0x39   : > { %1084 = vmatprep.subr.bf16.mxu0 %v1164_v40  ;;  %1103 = vmatprep.subr.bf16.mxu1 %v1164_v40 }
  0x3a   : > { %688 = vadd.xlane.f32.xlu0 %v687_v57  ;;  %v704_v60 = vadd.f32 %v703_v58, %v697_v54  ;;  %p1206_p2 = pneg %p1205_p1 }
  0x3c   : > { %1085 = vmatpush3.bf16.msra.mxu0 %v1164_v40  ;;  %1111 = vmatpush3.bf16.msra.mxu1 %v1164_v40 }
  0x3d   : > { %1086 = vmatprep.subr.bf16.mxu0 %v1165_v49  ;;  %1104 = vmatprep.subr.bf16.mxu1 %v1165_v49 }
  0x3e   : > { %705 = vadd.xlane.f32.xlu1 %v704_v60 }
  0x40   : > { %1087 = vmatpush3.bf16.msra.mxu0 %v1165_v49  ;;  %1112 = vmatpush3.bf16.msra.mxu1 %v1165_v49 }
  0x41   : > { %1088 = vmatprep.subr.bf16.mxu0 %v1166_v56  ;;  %1105 = vmatprep.subr.bf16.mxu1 %v1166_v56 }
  0x44   : > { %1089 = vmatpush3.bf16.msra.mxu0 %v1166_v56  ;;  %1113 = vmatpush3.bf16.msra.mxu1 %v1166_v56 }
  0x47   : > { %1091 = vmatmul.mubr.bf16.vlgmr.msra.gmra.mrb[0].mxu0 %v534_v0  ;;  %1095 = vmatmul.mubr.bf16.vlgmr.msra.gmra.mrb[0].mxu1 %v536_v1 }
  0xc7   : > { %v689_v3 = vpop.xlane.xlu0 %688 }
  0xc8   : > { %v707_v4 = vmul.f32 0.0009765625, %v689_v3 }
  0xca   : > { %v709_v11 = vmul.f32 %v707_v4, %v707_v4 }
  0xcb   : > { %v706_v5 = vpop.xlane.xlu1 %705 }
  0xcc   : > { %v708_v12 = vmul.f32 0.0009765625, %v706_v5 }
  0xce   : > { %v710_v25 = vsub.f32 %v708_v12, %v709_v11 }
  0xd0   : > { %v711_v40 = vadd.f32 1e-05, %v710_v25  ;;  %v778_v25 = vld [vmem:[%s515_s20] sm:$0xff] }
  0xd2   : > { %1167 = vrsqrt.f32 %v711_v40 }
  0xdc   : > { %v1168_v1 = vpop.eup %1167 }
  0xdd   : > { %v714_v3 = vmul.f32 %v1168_v1, %v713_v2 }
  0xdf   : > { %v716_v5 = vmul.f32 %v714_v3, %v707_v4 }
 0x11a   : > { %v1092_v7 = vpop.f32.mrb[0].mxu0  ;;  %v1096_v8 = vpop.f32.mrb[0].mxu1 }
 0x11b   : > { %v635_v9 = vpop.f32.mrb[1].mxu0  ;;  %v651_v10 = vpop.f32.mrb[1].mxu1  ;;  %v1507_v18 = vadd.f32 %v1092_v7, %v1049_v6  ;;  %v1532_v46 = vadd.f32 %v1096_v8, %v1049_v6 }
 0x11c   : > { %v1505_v13 = vadd.f32 %v1049_v6, %v635_v9  ;;  %v1093_v14 = vpop.f32.mrb[2].mxu0  ;;  %v1097_v15 = vpop.f32.mrb[2].mxu1  ;;  %v1511_v22 = vadd.f32 %v1049_v6, %v651_v10 }
 0x11d   : > { %v638_v16 = vpop.f32.mrb[3].mxu0  ;;  %v654_v17 = vpop.f32.mrb[3].mxu1  ;;  %v1515_v31 = vadd.f32 %v1093_v14, %v1049_v6  ;;  %v755_v34 = vmul.f32 %v1507_v18, %v1507_v18  ;;  %v1535_v51 = vadd.f32 %v1097_v15, %v1049_v6  ;;  %v759_v54 = vmul.f32 %v1532_v46, %v1532_v46 }
 0x11e   : > { %v1509_v19 = vadd.f32 %v1049_v6, %v638_v16  ;;  %v753_v30 = vmul.f32 %v1505_v13, %v1505_v13  ;;  %v757_v38 = vmul.f32 %v1511_v22, %v1511_v22  ;;  %v1529_v45 = vadd.f32 %v1049_v6, %v654_v17  ;;  %v715_v6 = vld [vmem:[%s507_s26] sm:$0xff]  ;;  %s1594_s26 = scalar_lea.sflag [#allocation5], %s440_s21 }
 0x11f   : > { %v756_v41 = vmul.f32 %v1515_v31, %v1515_v31  ;;  %v760_v58 = vmul.f32 %v1535_v51, %v1535_v51  ;;  %v717_v7 = vsub.f32 %v715_v6, %v716_v5  ;;  %v776_v16 = vld [vmem:[%s511_s13] sm:$0xff]  ;;  %s1207_s13 = sshll.u32 %s1268_s12, 4  ;;  %s1208_s13 = int_to_ptr.vmem [resolvable:$false] %s1207_s13 }
 0x120   : > { %v744_v32 = vadd.f32 %v1509_v19, %v1505_v13  ;;  %v754_v33 = vmul.f32 %v1509_v19, %v1509_v19  ;;  %v758_v53 = vmul.f32 %v1529_v45, %v1529_v45  ;;  %s1209_s18 = scalar_lea.vmem %s1208_s13, 2048  ;;  %p1210_p3 = scmp.lt.s32.totalorder %s1582_s22, %s1208_s13 }
 0x121   : > { %p1211_p4 = scmp.lt.s32.totalorder %s1209_s18, %s1203_s10 }
 0x122   : > { %v745_v36 = vadd.f32 %v744_v32, %v1507_v18  ;;  %v761_v37 = vadd.f32 %v754_v33, %v753_v30 }
 0x123   : > { %p1212_p5 = por %p1211_p4, %p1210_p3 }
 0x124   : > { %v762_v42 = vadd.f32 %v761_v37, %v755_v34  ;;  %v746_v43 = vadd.f32 %v745_v36, %v1515_v31 }
 0x125   : > { %p1213_p7 = pnand %p1212_p5, %p1206_p2 }
 0x126   : > { %v747_v47 = vadd.f32 %v746_v43, %v1511_v22  ;;  %v763_v49 = vadd.f32 %v762_v42, %v756_v41 }
 0x128   : > { %v764_v50 = vadd.f32 %v763_v49, %v757_v38  ;;  %v748_v52 = vadd.f32 %v747_v47, %v1529_v45 }
 0x12a   : > { %v749_v55 = vadd.f32 %v748_v52, %v1532_v46  ;;  %v765_v56 = vadd.f32 %v764_v50, %v758_v53 }
 0x12c   : > { %v750_v57 = vadd.f32 %v749_v55, %v1535_v51  ;;  %v766_v60 = vadd.f32 %v765_v56, %v759_v54 }
 0x12e   : > { %751 = vadd.xlane.f32.xlu0 %v750_v57  ;;  %v767_v0 = vadd.f32 %v766_v60, %v760_v58 }
 0x130   : > { %768 = vadd.xlane.f32.xlu1 %v767_v0 }
 0x141   : > { %733 = vperm.xlu1 %1158, %v717_v7  }
 0x144   : > { %720 = vperm.xlu0 %1157, %v714_v3  }
 0x1bb   : > { %v752_v8 = vpop.xlane.xlu0 %751 }
 0x1bc   : > { %v770_v9 = vmul.f32 0.0009765625, %v752_v8 }
 0x1bd   : > { %v769_v10 = vpop.xlane.xlu1 %768 }
 0x1be   : > { %v772_v11 = vmul.f32 %v770_v9, %v770_v9  ;;  %v771_v12 = vmul.f32 0.0009765625, %v769_v10 }
 0x1c0   : > { %v773_v14 = vsub.f32 %v771_v12, %v772_v11 }
 0x1c1   : > { %v734_v34 = vpop.permute.xlu1 %733 }
 0x1c2   : > { %v774_v15 = vadd.f32 1e-05, %v773_v14 }
 0x1c3   : > { %v721_v33 = vpop.permute.xlu0 %720 }
 0x1c4   : > { %1169 = vrsqrt.f32 %v774_v15  ;;  %v723_v36 = vmul.f32 %v721_v33, %v1427_v26  ;;  %v724_v37 = vmul.f32 %v721_v33, %v1430_v27  ;;  %v725_v38 = vmul.f32 %v721_v33, %v1433_v28 }
 0x1c5   : > { %v726_v40 = vmul.f32 %v721_v33, %v1436_v29  ;;  %v727_v41 = vmul.f32 %v721_v33, %v1450_v35  ;;  %v728_v42 = vmul.f32 %v721_v33, %v1456_v39  ;;  %v729_v43 = vmul.f32 %v721_v33, %v1465_v44 }
 0x1c6   : > { %v730_v49 = vmul.f32 %v721_v33, %v1471_v48  ;;  %v736_v50 = vadd.f32 %v734_v34, %v723_v36  ;;  %v737_v52 = vadd.f32 %v734_v34, %v724_v37  ;;  %v738_v53 = vadd.f32 %v734_v34, %v725_v38 }
 0x1c7   : > { %v739_v54 = vadd.f32 %v734_v34, %v726_v40  ;;  %v740_v26 = vadd.f32 %v734_v34, %v727_v41  ;;  %v741_v55 = vadd.f32 %v734_v34, %v728_v42  ;;  %v742_v27 = vadd.f32 %v734_v34, %v729_v43 }
 0x1ce   : > { %v1170_v4 = vpop.eup %1169 }
 0x1cf   : > { %v777_v17 = vmul.f32 %v1170_v4, %v776_v16 }
 0x1d1   : > { %783 = vperm.xlu1 %1158, %v777_v17   ;;  %v779_v30 = vmul.f32 %v777_v17, %v770_v9 }
 0x1d3   : > { %v780_v32 = vsub.f32 %v778_v25, %v779_v30 }
 0x1d5   : > { %796 = vperm.xlu1 %1158, %v780_v32  }
 0x250   : > { %v784_v47 = vpop.permute.xlu1 %783 }
 0x251   : > { %v786_v28 = vmul.f32 %v784_v47, %v1505_v13  ;;  %v787_v29 = vmul.f32 %v784_v47, %v1509_v19  ;;  %v788_v35 = vmul.f32 %v784_v47, %v1507_v18  ;;  %v789_v39 = vmul.f32 %v784_v47, %v1515_v31 }
 0x252   : > { %v790_v44 = vmul.f32 %v784_v47, %v1511_v22  ;;  %v791_v56 = vmul.f32 %v784_v47, %v1529_v45  ;;  %v792_v48 = vmul.f32 %v784_v47, %v1532_v46  ;;  %v793_v57 = vmul.f32 %v784_v47, %v1535_v51 }
 0x253   : > { %v743_v22 = vadd.f32 %v734_v34, %v730_v49 }
 0x254   : > { %v797_v58 = vpop.permute.xlu1 %796 }
 0x255   : > { %v799_v60 = vadd.f32 %v797_v58, %v786_v28  ;;  %v800_v0 = vadd.f32 %v797_v58, %v787_v29  ;;  %v801_v1 = vadd.f32 %v797_v58, %v788_v35  ;;  %v802_v2 = vadd.f32 %v797_v58, %v789_v39 }
 0x256   : > { %v803_v13 = vadd.f32 %v797_v58, %v790_v44  ;;  %v804_v3 = vadd.f32 %v797_v58, %v791_v56  ;;  %v805_v19 = vadd.f32 %v797_v58, %v792_v48  ;;  %v806_v5 = vadd.f32 %v797_v58, %v793_v57 }
 0x257   : > { %v807_v18 = vadd.f32 %v799_v60, %v736_v50  ;;  %v808_v6 = vadd.f32 %v800_v0, %v737_v52  ;;  %v809_v31 = vadd.f32 %v801_v1, %v738_v53  ;;  %v810_v7 = vadd.f32 %v802_v2, %v739_v54 }
 0x258   : > { %v811_v8 = vadd.f32 %v803_v13, %v740_v26  ;;  %v812_v45 = vadd.f32 %v804_v3, %v741_v55  ;;  %v813_v9 = vadd.f32 %v805_v19, %v742_v27  ;;  %v814_v11 = vadd.f32 %v806_v5, %v743_v22 }
 0x259   : > { %v1050_v46 = vmul.f32 -1.442695, %v807_v18  ;;  %v1051_v10 = vmul.f32 -1.442695, %v808_v6  ;;  %v1052_v51 = vmul.f32 -1.442695, %v809_v31 }
 0x25a   : > { %v1053_v12 = vmul.f32 -1.442695, %v810_v7  ;;  %v1054_v14 = vmul.f32 -1.442695, %v811_v8  ;;  %v1055_v15 = vmul.f32 -1.442695, %v812_v45 }
 0x25b   : > { %1171 = vpow2.f32 %v1050_v46  ;;  %v1056_v16 = vmul.f32 -1.442695, %v813_v9  ;;  %v1057_v4 = vmul.f32 -1.442695, %v814_v11 }
 0x25c   : > { %1173 = vpow2.f32 %v1051_v10 }
 0x25d   : > { %1175 = vpow2.f32 %v1052_v51 }
 0x25e   : > { %1177 = vpow2.f32 %v1053_v12 }
 0x25f   : > { %1179 = vpow2.f32 %v1054_v14 }
 0x260   : > { %1181 = vpow2.f32 %v1055_v15 }
 0x261   : > { %1183 = vpow2.f32 %v1056_v16 }
 0x262   : > { %1185 = vpow2.f32 %v1057_v4 }
 0x265   : > { %v1172_v17 = vpop.eup %1171 }
 0x266   : > { %v1174_v25 = vpop.eup %1173  ;;  %v839_v30 = vadd.f32 1.0, %v1172_v17 }
 0x267   : > { %v1176_v32 = vpop.eup %1175  ;;  %v840_v33 = vadd.f32 1.0, %v1174_v25 }
 0x268   : > { %v1178_v34 = vpop.eup %1177  ;;  %v841_v36 = vadd.f32 1.0, %v1176_v32  ;;  %1187 = vrcp.f32 %v839_v30 }
 0x269   : > { %v1180_v37 = vpop.eup %1179  ;;  %v842_v38 = vadd.f32 1.0, %v1178_v34  ;;  %1189 = vrcp.f32 %v840_v33 }
 0x26a   : > { %v1182_v40 = vpop.eup %1181  ;;  %v843_v41 = vadd.f32 1.0, %v1180_v37  ;;  %1191 = vrcp.f32 %v841_v36 }
 0x26b   : > { %v1184_v42 = vpop.eup %1183  ;;  %v844_v43 = vadd.f32 1.0, %v1182_v40  ;;  %1193 = vrcp.f32 %v842_v38 }
 0x26c   : > { %v1186_v47 = vpop.eup %1185  ;;  %v845_v49 = vadd.f32 1.0, %v1184_v42  ;;  %1195 = vrcp.f32 %v843_v41 }
 0x26d   : > { %v846_v50 = vadd.f32 1.0, %v1186_v47  ;;  %1197 = vrcp.f32 %v844_v43 }
 0x26e   : > { %1199 = vrcp.f32 %v845_v49 }
 0x26f   : > { %1201 = vrcp.f32 %v846_v50 }
 0x272   : > { %v1188_v52 = vpop.eup %1187 }
 0x273   : > { %v1190_v53 = vpop.eup %1189  ;;  %v863_v54 = vmul.f32 %v1188_v52, %v1408_v20 }
 0x274   : > { %v1192_v26 = vpop.eup %1191  ;;  %v864_v55 = vmul.f32 %v1190_v53, %v1411_v21 }
 0x275   : > { %v1194_v27 = vpop.eup %1193  ;;  %v865_v28 = vmul.f32 %v1192_v26, %v1487_v59  ;;  %871 = vst [vmem:[%s499_s19] sm:$0xff] %v863_v54 }
 0x276   : > { %v1196_v29 = vpop.eup %1195  ;;  %v866_v35 = vmul.f32 %v1194_v27, %v1490_v61  ;;  %872 = vst [vmem:[%s499_s19 + $0x8] sm:$0xff] %v864_v55 }
 0x277   : > { %v1198_v39 = vpop.eup %1197  ;;  %v867_v44 = vmul.f32 %v1196_v29, %v1416_v23  ;;  %873 = vst [vmem:[%s499_s19 + $0x10] sm:$0xff] %v865_v28 }
 0x278   : > { %v1200_v20 = vpop.eup %1199  ;;  %v868_v21 = vmul.f32 %v1198_v39, %v1419_v24  ;;  %874 = vst [vmem:[%s499_s19 + $0x18] sm:$0xff] %v866_v35 }
 0x279   : > { %v1202_v59 = vpop.eup %1201  ;;  %v869_v56 = vmul.f32 %v1200_v20, %v1493_v62  ;;  %875 = vst [vmem:[%s499_s19 + $0x20] sm:$0xff] %v867_v44 }
 0x27a   : > { %v870_v23 = vmul.f32 %v1202_v59, %v1496_v63  ;;  %876 = vst [vmem:[%s499_s19 + $0x28] sm:$0xff] %v868_v21 }
 0x27b   : > { %877 = vst [vmem:[%s499_s19 + $0x30] sm:$0xff] %v869_v56 }
 0x27c   : > { %878 = vst [vmem:[%s499_s19 + $0x38] sm:$0xff] %v870_v23 }
 0x27d   : > { %1216 = shalt.err (!%p1213_p7)
}
 0x27e   : > { %s1217_s21 = scalar_lea.hbm %s1589_s25, 1024  ;;  %s1221_s19 = scalar_lea.hbm %s1644_s8, 2048 }
 0x27f   : > { %p1218_p10 = scmp.ne.s32.totalorder %s1589_s25, %s1217_s21  ;;  %p1222_p13 = scmp.lt.u32.totalorder %s1589_s25, %s1644_s8 }
 0x280   : > { %p1223_p0 = scmp.lt.u32.totalorder %s1221_s19, %s1217_s21  ;;  %p1225_p2 = scmp.lt.u32.totalorder %s1217_s21, %s1589_s25 }
 0x281   : > { %p1219_p11 = pnand %p1218_p10, %p1360_p6 }
 0x282   : > { %p1224_p1 = por %p1223_p0, %p1222_p13 }
 0x283   : > { %p1220_p12 = pneg %p1219_p11 }
 0x284   : > { %p1226_p3 = por %p1225_p2, %p1224_p1 }
 0x286   : > { %p1227_p4 = pnand %p1226_p3, %p1220_p12 }
 0x288   : > { %1230 = shalt.err (!%p1227_p4)
}
 0x289   : > { %s1269_s24 = smov 128   ;;  %s1270_s10 = smov 256  }
 0x28a   : > { %s1271_s12 = smov 8  }
 0x28b   : > { %1114 = dma.vmem_to_hbm [thread:$0]  (%p1360_p6), %s1582_s22, 1024, %s1589_s25, %s1594_s26, %s1269_s24, %s1270_s10, %s1271_s12  }
 0x28c PF: > { %s907_s13 = sand.u32 1, %s1253_s27   ;;  %p1117_p5 = pnand %p1028_p9, %p1364_p8 }
 0x28d   : > { %s908_s18 = scalar_lea.sflag [#allocation5], %s907_s13 }
 0x28e   : > { %1248 = dma.done.wait (!%p1117_p5), %s908_s18, 1024  }
 0x28f   : > { %1250 = vsyncadd (!%p1117_p5), %s908_s18, 4294966272  ;;  %p18_p7 = scmp.ge.s32.totalorder %s1342_s11, 4   ;;  %s1648_s27 = smov %s1257_s28 }
 0x290   : > { %s1649_s28 = smov %s1261_s29  ;;  %s1650_s29 = smov %s1354_s14 }
 0x291   : > { %s1651_s30 = smov %s1342_s11  ;;  %20 = sbr.rel (!%p18_p7) target bundleno = 3 (0x3), region = 188 }
 0x298   :  { %913 = vsyncpa [#allocation5], 1 }
 0x299   :  { %915 = vsyncpa [#allocation5 + $0x1], 1 }

</bundles_post_ra>
